<compile_context>
chip_gen: v6e
topology: v6e:2x2x1
jax: 0.10.0
libtpu: 0.0.40
codegen_flags: <defaults>
</compile_context>

<pallas_src>
import jax
import jax.numpy as jnp
from jax.experimental import pallas as pl
from jax.experimental.pallas import tpu as pltpu

IN_DIM = 15
OUT_DIM = 1
N_DOMAINS = 3
_LANE = 128
_SUBLANE = 8


def _round_up(v, m):
    return ((v + m - 1) // m) * m


def _slab_layout(hidden):
    """Static offsets of every parameter block inside the packed param slab."""
    h3 = 3 * hidden
    head_out = N_DOMAINS + 2 * OUT_DIM                    # adv(3) | out1 | out2
    in_pad = _round_up(IN_DIM, _SUBLANE)                  # 16 (x K-dim padding)
    cols = _round_up(h3 + head_out, _LANE)                # lane-dense slab width
    enc_w_row = 0                                         # rows [0, 16): w_enc (row 15 zero)
    enc_b_row = in_pad                                    # row 16: b_enc
    head_w_row = _round_up(enc_b_row + 1, _SUBLANE)       # row 24: w_head (cols rows)
    head_b_row = head_w_row + cols                        # b_head row
    rows = _round_up(head_b_row + 1, _SUBLANE)
    return dict(h3=h3, in_pad=in_pad, cols=cols,
                enc_w_row=enc_w_row, enc_b_row=enc_b_row,
                head_w_row=head_w_row, head_b_row=head_b_row, rows=rows)


def _pack_params(params, lay):
    """Pack all weights/biases into one zero-padded f32 slab (wrapper-side XLA)."""
    hidden = params["ws"].shape[1]
    h3, cols = lay["h3"], lay["cols"]

    # Encoder block: [shared | private_1 | private_2]
    w_enc = jnp.concatenate([params["ws"], params["wp1"], params["wp2"]], axis=1)  # (15, 3H)
    b_enc = jnp.concatenate([params["bs"], params["bp1"], params["bp2"]], axis=1)  # (1, 3H)

    # Head block over a_full = [a_shared | a_p1 | a_p2 | 0-pad]:
    #   cols 0:3H      -> identity pass-through (a_full copied to the output slab)
    #   cols 3H:3H+3   -> discriminator (uses a_shared rows only)
    #   col  3H+3      -> fc1 logits  ([w1_shared ; w1_private ; 0])
    #   col  3H+4      -> fc2 logits  ([w2_shared ; 0 ; w2_private])
    w1, w2 = params["w1"], params["w2"]                   # (2H, 1) each
    w_head = jnp.zeros((cols, cols), jnp.float32)
    w_head = w_head.at[0:h3, 0:h3].set(jnp.eye(h3, dtype=jnp.float32))
    w_head = w_head.at[0:hidden, h3:h3 + N_DOMAINS].set(params["wd"])
    w_head = w_head.at[0:hidden, h3 + N_DOMAINS].set(w1[:hidden, 0])
    w_head = w_head.at[hidden:2 * hidden, h3 + N_DOMAINS].set(w1[hidden:, 0])
    w_head = w_head.at[0:hidden, h3 + N_DOMAINS + 1].set(w2[:hidden, 0])
    w_head = w_head.at[2 * hidden:h3, h3 + N_DOMAINS + 1].set(w2[hidden:, 0])

    b_head = jnp.zeros((cols,), jnp.float32)
    b_head = b_head.at[h3:h3 + N_DOMAINS].set(params["bd"][0])
    b_head = b_head.at[h3 + N_DOMAINS].set(params["b1"][0, 0])
    b_head = b_head.at[h3 + N_DOMAINS + 1].set(params["b2"][0, 0])

    slab = jnp.zeros((lay["rows"], lay["cols"]), jnp.float32)
    slab = slab.at[lay["enc_w_row"]:lay["enc_w_row"] + IN_DIM, 0:h3].set(w_enc)
    slab = slab.at[lay["enc_b_row"], 0:h3].set(b_enc[0])
    slab = slab.at[lay["head_w_row"]:lay["head_w_row"] + cols, :].set(w_head)
    slab = slab.at[lay["head_b_row"], :].set(b_head)
    return slab


def _make_kernel(lay, matmul_dtype):
    h3, cols, in_pad = lay["h3"], lay["cols"], lay["in_pad"]
    ebr, hwr, hbr = lay["enc_b_row"], lay["head_w_row"], lay["head_b_row"]

    def kernel(x_ref, p_ref, out_ref):
        x = x_ref[...]                                            # (tile, 16) f32

        # --- fused encoder: one MXU matmul + one tanh (lanes 3H:cols stay 0) ---
        w_enc = p_ref[0:in_pad, :]                                # (16, cols) aligned view
        b_enc = p_ref[ebr:ebr + 1, :]                             # (1, cols)
        a_full = jnp.tanh(
            jnp.dot(x.astype(matmul_dtype), w_enc.astype(matmul_dtype),
                    preferred_element_type=jnp.float32) + b_enc)  # (tile, cols)

        # --- fused head: [identity | disc | fc1 | fc2] in one MXU matmul -------
        # (gradient reversal is identity in the forward pass)
        w_head = p_ref[hwr:hwr + cols, :]                         # (cols, cols) aligned view
        b_head = p_ref[hbr:hbr + 1, :]                            # (1, cols)
        full = jnp.dot(a_full.astype(matmul_dtype), w_head.astype(matmul_dtype),
                       preferred_element_type=jnp.float32) + b_head

        # sigmoid only on the fc1/fc2 lanes; adv / activation lanes stay raw
        lane = jax.lax.broadcasted_iota(jnp.int32, full.shape, 1)
        is_sig = (lane >= h3 + N_DOMAINS) & (lane < h3 + N_DOMAINS + 2 * OUT_DIM)
        full = jnp.where(is_sig, jax.nn.sigmoid(full), full)

        # --- single full-width lane-dense store --------------------------------
        out_ref[...] = full.astype(out_ref.dtype)

    return kernel


def adversarial_mtl_forward(x, params, *, max_tile_n=8192,
                            matmul_dtype=jnp.float32, out_dtype=jnp.float32):
    """x: (..., 15) -> (out1, out2, adversarial_out, (a_shared, a_p1, a_p2))."""
    hidden = params["ws"].shape[1]
    lay = _slab_layout(hidden)
    h3, cols, in_pad = lay["h3"], lay["cols"], lay["in_pad"]

    x2d = x.reshape(-1, IN_DIM).astype(jnp.float32)
    n = x2d.shape[0]

    # Row tile: cap for VMEM, round to sublane, pad the batch to a multiple.
    tile_n = max(_SUBLANE,
                 min(_round_up(max_tile_n, _SUBLANE), _round_up(n, _SUBLANE)))
    n_pad = _round_up(n, tile_n)
    grid = (n_pad // tile_n,)

    # Pad rows (ragged last tile) and columns (K=15 -> 16; slab row 15 is zero).
    x_padded = jnp.zeros((n_pad, in_pad), jnp.float32).at[:n, :IN_DIM].set(x2d)

    slab = _pack_params(params, lay)

    out_slab = pl.pallas_call(
        _make_kernel(lay, matmul_dtype),
        out_shape=jax.ShapeDtypeStruct((n_pad, cols), out_dtype),
        grid_spec=pltpu.PrefetchScalarGridSpec(
            num_scalar_prefetch=0,
            grid=grid,
            in_specs=[
                pl.BlockSpec((tile_n, in_pad), lambda i: (i, 0)),
                # constant index_map -> param slab DMA'd once, stays resident
                pl.BlockSpec((lay["rows"], cols), lambda i: (0, 0)),
            ],
            out_specs=pl.BlockSpec((tile_n, cols), lambda i: (i, 0)),
        ),
        compiler_params=pltpu.CompilerParams(
            dimension_semantics=("parallel",)),
    )(x_padded, slab)

    a_s = out_slab[:n, 0:hidden]
    a_p1 = out_slab[:n, hidden:2 * hidden]
    a_p2 = out_slab[:n, 2 * hidden:h3]
    adv = out_slab[:n, h3:h3 + N_DOMAINS]
    out1 = out_slab[:n, h3 + N_DOMAINS:h3 + N_DOMAINS + OUT_DIM]
    out2 = out_slab[:n, h3 + N_DOMAINS + OUT_DIM:h3 + N_DOMAINS + 2 * OUT_DIM]
    return out1, out2, adv, (a_s, a_p1, a_p2)


def init_params(key, hidden_unit=32):
    """Deterministic synthetic parameters, stored as (in_features, out_features)."""
    keys = jax.random.split(key, 12)

    def lin(kw, kb, fan_in, fan_out):
        bound = 1.0 / jnp.sqrt(fan_in)
        w = jax.random.uniform(kw, (fan_in, fan_out), jnp.float32, -bound, bound)
        b = jax.random.uniform(kb, (1, fan_out), jnp.float32, -bound, bound)
        return w, b

    ws, bs = lin(keys[0], keys[1], IN_DIM, hidden_unit)
    wp1, bp1 = lin(keys[2], keys[3], IN_DIM, hidden_unit)
    wp2, bp2 = lin(keys[4], keys[5], IN_DIM, hidden_unit)
    wd, bd = lin(keys[6], keys[7], hidden_unit, N_DOMAINS)
    w1, b1 = lin(keys[8], keys[9], 2 * hidden_unit, OUT_DIM)
    w2, b2 = lin(keys[10], keys[11], 2 * hidden_unit, OUT_DIM)

    return {
        "ws": ws, "bs": bs,
        "wp1": wp1, "bp1": bp1,
        "wp2": wp2, "bp2": bp2,
        "wd": wd, "bd": bd,
        "w1": w1, "b1": b1,
        "w2": w2, "b2": b2,
    }


def _reference_forward(x, params):
    """Pure-JAX reference of the PyTorch forward."""
    x2d = x.reshape(-1, IN_DIM)
    a_s = jnp.tanh(x2d @ params["ws"] + params["bs"])
    a_p1 = jnp.tanh(x2d @ params["wp1"] + params["bp1"])
    a_p2 = jnp.tanh(x2d @ params["wp2"] + params["bp2"])
    adv = a_s @ params["wd"] + params["bd"]
    out1 = jax.nn.sigmoid(
        jnp.concatenate([a_s, a_p1], axis=1) @ params["w1"] + params["b1"])
    out2 = jax.nn.sigmoid(
        jnp.concatenate([a_s, a_p2], axis=1) @ params["w2"] + params["b2"])
    return out1, out2, adv, a_s, a_p1, a_p2


def _flatten(outs):
    out1, out2, adv, (a_s, a_p1, a_p2) = outs
    return out1, out2, adv, a_s, a_p1, a_p2


if __name__ == "__main__":
    key = jax.random.PRNGKey(0)
    k_x, k_p, k_x2 = jax.random.split(key, 3)

    hidden = 32
    params = init_params(k_p, hidden_unit=hidden)

    # ---- Test 1: small batch, single tile, exact f32 path --------------------
    x = jax.random.normal(k_x, (8, IN_DIM), dtype=jnp.float32)
    outs = jax.block_until_ready(adversarial_mtl_forward(x, params))
    refs = _reference_forward(x, params)
    for got, ref in zip(_flatten(outs), refs):
        assert got.shape == ref.shape, (got.shape, ref.shape)
        assert jnp.allclose(got, ref, atol=1e-5, rtol=1e-5), \
            float(jnp.max(jnp.abs(got - ref)))

    # ---- Test 2: multi-tile grid with ragged last tile, exact f32 path -------
    x2 = jax.random.normal(k_x2, (20, IN_DIM), dtype=jnp.float32)
    outs2 = jax.block_until_ready(
        adversarial_mtl_forward(x2, params, max_tile_n=8))          # grid = 3, pad 20->24
    refs2 = _reference_forward(x2, params)
    for got, ref in zip(_flatten(outs2), refs2):
        assert got.shape == ref.shape, (got.shape, ref.shape)
        assert jnp.allclose(got, ref, atol=1e-5, rtol=1e-5), \
            float(jnp.max(jnp.abs(got - ref)))

    # ---- Test 3: gated bf16 fast path (MXU-native operands, bf16 writeback) --
    x3 = jax.random.normal(k_x, (32, IN_DIM), dtype=jnp.float32)
    outs3 = jax.block_until_ready(
        adversarial_mtl_forward(x3, params, max_tile_n=16,
                                matmul_dtype=jnp.bfloat16,
                                out_dtype=jnp.bfloat16))            # grid = 2
    refs3 = _reference_forward(x3, params)
    for got, ref in zip(_flatten(outs3), refs3):
        assert got.shape == ref.shape, (got.shape, ref.shape)
        assert jnp.allclose(got.astype(jnp.float32), ref, atol=1e-1, rtol=1e-1), \
            float(jnp.max(jnp.abs(got.astype(jnp.float32) - ref)))

    print("KERNEL_OK")
</pallas_src>

<mosaic_0001>
module attributes {stable_mosaic.version = 11 : i64} {
  func.func @kernel(%arg0: i32, %arg1: memref<8x16xf32, #tpu.memory_space<vmem>>, %arg2: memref<160x128xf32, #tpu.memory_space<vmem>>, %arg3: memref<8x128xf32, #tpu.memory_space<vmem>>) attributes {dimension_semantics = [#tpu.dimension_semantics<parallel>], iteration_bounds = array<i64: 1>, scalar_prefetch = 0 : i64, scratch_operands = 0 : i64, tpu.core_type = #tpu.core_type<tc>, window_params = [{transform_indices = @transform_0, window_bounds = array<i64: 8, 16>}, {pipeline_mode = #tpu.pipeline_mode<synchronous>, transform_indices = @transform_1, window_bounds = array<i64: 160, 128>}, {transform_indices = @transform_2, window_bounds = array<i64: 8, 128>}]} {
    %c0 = arith.constant 0 : index
    %c0_0 = arith.constant 0 : index
    %0 = vector.load %arg1[%c0, %c0_0] : memref<8x16xf32, #tpu.memory_space<vmem>>, vector<8x16xf32>
    %c0_1 = arith.constant 0 : index
    %c0_2 = arith.constant 0 : index
    %1 = vector.load %arg2[%c0_1, %c0_2] : memref<160x128xf32, #tpu.memory_space<vmem>>, vector<16x128xf32>
    %c16 = arith.constant 16 : index
    %c0_3 = arith.constant 0 : index
    %2 = vector.load %arg2[%c16, %c0_3] : memref<160x128xf32, #tpu.memory_space<vmem>>, vector<1x128xf32>
    %cst = arith.constant dense<0.000000e+00> : vector<8x128xf32>
    %3 = tpu.matmul %0, %1, %cst {dimension_numbers = #tpu.dot_dimension_numbers<[1], [0], [0], [1], [0, 0, 1, 1], [], []>} : vector<8x16xf32>, vector<16x128xf32>, vector<8x128xf32> -> vector<8x128xf32>
    %4 = vector.broadcast %2 : vector<1x128xf32> to vector<8x128xf32>
    %5 = arith.addf %3, %4 : vector<8x128xf32>
    %6 = math.tanh %5 : vector<8x128xf32>
    %c24 = arith.constant 24 : index
    %c0_4 = arith.constant 0 : index
    %7 = vector.load %arg2[%c24, %c0_4] : memref<160x128xf32, #tpu.memory_space<vmem>>, vector<128x128xf32>
    %c152 = arith.constant 152 : index
    %c0_5 = arith.constant 0 : index
    %8 = vector.load %arg2[%c152, %c0_5] : memref<160x128xf32, #tpu.memory_space<vmem>>, vector<1x128xf32>
    %cst_6 = arith.constant dense<0.000000e+00> : vector<8x128xf32>
    %9 = tpu.matmul %6, %7, %cst_6 {dimension_numbers = #tpu.dot_dimension_numbers<[1], [0], [0], [1], [0, 0, 1, 1], [], []>} : vector<8x128xf32>, vector<128x128xf32>, vector<8x128xf32> -> vector<8x128xf32>
    %10 = vector.broadcast %8 : vector<1x128xf32> to vector<8x128xf32>
    %11 = arith.addf %9, %10 : vector<8x128xf32>
    %12 = tpu.iota {dimensions = array<i32: 1>} : vector<8x128xi32>
    %c99_i32 = arith.constant 99 : i32
    %13 = vector.broadcast %c99_i32 : i32 to vector<8x128xi32>
    %14 = arith.cmpi sge, %12, %13 : vector<8x128xi32>
    %c101_i32 = arith.constant 101 : i32
    %15 = vector.broadcast %c101_i32 : i32 to vector<8x128xi32>
    %16 = arith.cmpi slt, %12, %15 : vector<8x128xi32>
    %17 = arith.andi %14, %16 : vector<8x128xi1>
    %18 = arith.negf %11 : vector<8x128xf32>
    %19 = math.exp %18 : vector<8x128xf32>
    %cst_7 = arith.constant 1.000000e+00 : f32
    %20 = vector.broadcast %cst_7 : f32 to vector<8x128xf32>
    %21 = arith.addf %20, %19 : vector<8x128xf32>
    %22 = arith.divf %20, %21 : vector<8x128xf32>
    %23 = arith.select %17, %22, %11 : vector<8x128xi1>, vector<8x128xf32>
    %c0_8 = arith.constant 0 : index
    %c0_9 = arith.constant 0 : index
    %24 = vector.load %arg3[%c0_8, %c0_9] : memref<8x128xf32, #tpu.memory_space<vmem>>, vector<8x128xf32>
    tpu.vector_store %arg3[%c0_8, %c0_9], %23 {strides = array<i32>} : memref<8x128xf32, #tpu.memory_space<vmem>>, vector<8x128xf32>,
    return
  }
  func.func @transform_0(%arg0: i32) -> (i32, i32) {
    %c0_i32 = arith.constant 0 : i32
    %c0_i32_0 = arith.constant 0 : i32
    return %arg0, %c0_i32 : i32, i32
  }
  func.func @transform_1(%arg0: i32) -> (i32, i32) {
    %c0_i32 = arith.constant 0 : i32
    %c0_i32_0 = arith.constant 0 : i32
    %c0_i32_1 = arith.constant 0 : i32
    return %c0_i32, %c0_i32_0 : i32, i32
  }
  func.func @transform_2(%arg0: i32) -> (i32, i32) {
    %c0_i32 = arith.constant 0 : i32
    %c0_i32_0 = arith.constant 0 : i32
    return %arg0, %c0_i32 : i32, i32
  }
}

</mosaic_0001>

<bundles_post_ra>
// kernel: tpu_custom_call.1
= control target key start
LH: loop header
LB: loop body
LE: loop exit
PB: predicated region body
PF: predicated region fallthrough
CT: control target
= control target key end

     0   :  { %7 = vsyncpa [#allocation3], 0  ;;  %s417_s0 = inlined_call_operand.hbm [shape: f32[8,16], index: 0, kind: input, shape index: {}]   ;;  %s418_s1 = inlined_call_operand.hbm [shape: f32[160,128], index: 1, kind: input, shape index: {}]   ;;  %s419_s2 = inlined_call_operand.hbm [shape: f32[8,128], index: 2, kind: output, shape index: {}]  }
   0x1   :  { %8 = vsyncpa [#allocation6], 0 }
   0x2   :  { %9 = vsyncpa [#allocation4], 0  ;;  %s386_s9 = smov [#allocation2]   ;;  %s387_s11 = smov [#allocation5]  }
   0x3   :  { %s16_s10 = sshll.u32 %s386_s9, 4  ;;  %s25_s12 = sshll.u32 %s387_s11, 4  ;;  %s17_s10 = int_to_ptr.vmem [resolvable:$true] %s16_s10  ;;  %s26_s12 = int_to_ptr.vmem [resolvable:$true] %s25_s12 }
   0x4   :  { %s328_s13 = scalar_lea.vmem %s17_s10, 128  ;;  %p333_p1 = scmp.lt.s32.totalorder %s17_s10, %s17_s10 }
   0x5   :  { %p329_p0 = scmp.ne.s32.totalorder %s17_s10, %s328_s13  ;;  %p334_p2 = scmp.lt.s32.totalorder %s328_s13, %s328_s13 }
   0x7   :  { %p335_p3 = por %p334_p2, %p333_p1 }
   0x9   :  { %p336_p4 = pnand %p335_p3, %p329_p0 }
   0xb   :  { %339 = shalt.err (!%p336_p4)
}
   0xc   :  { %19 = dma.hbm_to_vmem [thread:$0]  %s417_s0, 128, %s17_s10, [#allocation3]  }
   0xd   :  { %s348_s16 = scalar_lea.vmem %s26_s12, 2560  ;;  %p353_p6 = scmp.lt.s32.totalorder %s26_s12, %s26_s12 }
   0xe   :  { %p349_p5 = scmp.ne.s32.totalorder %s26_s12, %s348_s16  ;;  %p354_p7 = scmp.lt.s32.totalorder %s348_s16, %s348_s16 }
  0x10   :  { %p355_p8 = por %p354_p7, %p353_p6 }
  0x12   :  { %p356_p9 = pnand %p355_p8, %p349_p5 }
  0x14   :  { %359 = shalt.err (!%p356_p9)
}
  0x15   :  { %s388_s17 = smov 128   ;;  %s389_s18 = smov 8  }
  0x16   :  { %31 = dma.hbm_to_vmem [thread:$0]  %s418_s1, 2560, %s26_s12, [#allocation6], %s388_s17, %s388_s17, %s389_s18  }
  0x17   :  { %380 = dma.done.wait [#allocation3], 128  }
  0x18   :  { %381 = vsyncadd [#allocation3], 4294967168 }
  0x19   :  { %382 = dma.done.wait [#allocation6], 2560  }
  0x1a   :  { %383 = vsyncadd [#allocation6], 4294964736  ;;  %v390_v0 = vmov 0.0   ;;  %vm391_vm0 = vmmov 0   ;;  %v40_v1 = vld [vmem:[#allocation5 + $0x8] sm:$0xff]  ;;  %v39_v2 = vld [vmem:[#allocation5] sm:$0xff]  ;;  %v212_v32 = vlaneseq }
  0x1b   :  { %265 = vmatprep.subr.mxu0 %v390_v0  ;;  %269 = vmatprep.mubr.msk.f32.mxu0 %vm391_vm0, %v390_v0  ;;  %v38_v3 = vld [vmem:[#allocation2] sm:$0xff]  ;;  %vm46_vm1 = vcmask 130048   ;;  %v136_v4 = vld [vmem:[#allocation5 + $0x90] sm:$0xff]  ;;  %v135_v5 = vld [vmem:[#allocation5 + $0x88] sm:$0xff]  ;;  %s392_s0 = smov [#allocation7]  }
  0x1c   :  { %272 = vmatprep.subr.mxu1 %v390_v0  ;;  %304 = vmatprep.mubr.msk.f32.mxu1 %vm391_vm0, %v390_v0  ;;  %v134_v6 = vld [vmem:[#allocation5 + $0x80] sm:$0xff]  ;;  %v133_v7 = vld [vmem:[#allocation5 + $0x78] sm:$0xff]  ;;  %v132_v8 = vld [vmem:[#allocation5 + $0x70] sm:$0xff]  ;;  %v213_v33 = vand.u32 127, %v212_v32  ;;  %s231_s1 = sshll.u32 %s392_s0, 4  ;;  %s232_s1 = int_to_ptr.vmem [resolvable:$true] %s231_s1 }
  0x1d   :  { %266 = vmatpush3.msra.mxu0 %v40_v1  ;;  %273 = vmatpush3.msra.mxu1 %v136_v4  ;;  %v131_v9 = vld [vmem:[#allocation5 + $0x68] sm:$0xff]  ;;  %v130_v10 = vld [vmem:[#allocation5 + $0x60] sm:$0xff]  ;;  %v129_v11 = vld [vmem:[#allocation5 + $0x58] sm:$0xff]  ;;  %s360_s21 = scalar_lea.vmem %s232_s1, 128  ;;  %p365_p11 = scmp.lt.s32.totalorder %s232_s1, %s232_s1 }
  0x1e   :  { %267 = vmatprep.subr.mxu0 %v390_v0  ;;  %274 = vmatprep.subr.mxu1 %v390_v0  ;;  %v128_v12 = vld [vmem:[#allocation5 + $0x50] sm:$0xff]  ;;  %v127_v13 = vld [vmem:[#allocation5 + $0x48] sm:$0xff]  ;;  %v126_v14 = vld [vmem:[#allocation5 + $0x40] sm:$0xff]  ;;  %vm214_vm2 = vcmp.ge.s32.totalorder %v213_v33, 99  ;;  %vm215_vm3 = vcmp.lt.s32.totalorder %v213_v33, 101  ;;  %p361_p10 = scmp.ne.s32.totalorder %s232_s1, %s360_s21  ;;  %p366_p12 = scmp.lt.s32.totalorder %s360_s21, %s360_s21 }
  0x1f   :  { %268 = vmatpush3.msra.mxu0 %v39_v2  ;;  %275 = vmatpush3.msra.mxu1 %v135_v5  ;;  %v125_v15 = vld [vmem:[#allocation5 + $0x38] sm:$0xff]  ;;  %v124_v16 = vld [vmem:[#allocation5 + $0x30] sm:$0xff]  ;;  %v123_v17 = vld [vmem:[#allocation5 + $0x28] sm:$0xff] }
  0x20   :  { %270 = vmatmul.mubr.msk.f32.vlgmr.msra.gmra.mxu0 %vm46_vm1, %v38_v3  ;;  %276 = vmatprep.subr.mxu1 %v390_v0  ;;  %v122_v18 = vld [vmem:[#allocation5 + $0x20] sm:$0xff]  ;;  %v121_v19 = vld [vmem:[#allocation5 + $0x18] sm:$0xff]  ;;  %v241_v20 = vld [vmem:[#allocation5 + $0x10] ss:$0 sm:$0xff]  ;;  %p367_p13 = por %p366_p12, %p365_p11 }
  0x21   :  { %277 = vmatpush3.msra.mxu1 %v134_v6  ;;  %v243_v25 = vld [vmem:[#allocation5 + $0x98] ss:$0 sm:$0xff]  ;;  %vm216_vm4 = vmand %vm214_vm2, %vm215_vm3 }
  0x22   :  { %278 = vmatprep.subr.mxu1 %v390_v0  ;;  %p368_p0 = pnand %p367_p13, %p361_p10 }
  0x23   :  { %279 = vmatpush3.msra.mxu1 %v133_v7 }
  0x24   :  { %280 = vmatprep.subr.mxu1 %v390_v0 }
  0x25   :  { %281 = vmatpush3.msra.mxu1 %v132_v8 }
  0x26   :  { %282 = vmatprep.subr.mxu1 %v390_v0 }
  0x27   :  { %283 = vmatpush3.msra.mxu1 %v131_v9 }
  0x28   :  { %284 = vmatprep.subr.mxu1 %v390_v0 }
  0x29   :  { %285 = vmatpush3.msra.mxu1 %v130_v10 }
  0x2a   :  { %286 = vmatprep.subr.mxu1 %v390_v0 }
  0x2b   :  { %287 = vmatpush3.msra.mxu1 %v129_v11 }
  0x2c   :  { %288 = vmatprep.subr.mxu1 %v390_v0 }
  0x2d   :  { %289 = vmatpush3.msra.mxu1 %v128_v12 }
  0x2e   :  { %290 = vmatprep.subr.mxu1 %v390_v0 }
  0x2f   :  { %291 = vmatpush3.msra.mxu1 %v127_v13 }
  0x30   :  { %292 = vmatprep.subr.mxu1 %v390_v0 }
  0x31   :  { %293 = vmatpush3.msra.mxu1 %v126_v14 }
  0x32   :  { %294 = vmatprep.subr.mxu1 %v390_v0 }
  0x33   :  { %295 = vmatpush3.msra.mxu1 %v125_v15 }
  0x34   :  { %296 = vmatprep.subr.mxu1 %v390_v0 }
  0x35   :  { %297 = vmatpush3.msra.mxu1 %v124_v16 }
  0x36   :  { %298 = vmatprep.subr.mxu1 %v390_v0 }
  0x37   :  { %299 = vmatpush3.msra.mxu1 %v123_v17 }
  0x38   :  { %300 = vmatprep.subr.mxu1 %v390_v0 }
  0x39   :  { %301 = vmatpush3.msra.mxu1 %v122_v18 }
  0x3a   :  { %302 = vmatprep.subr.mxu1 %v390_v0 }
  0x3b   :  { %303 = vmatpush3.msra.mxu1 %v121_v19 }
  0xe0   :  { %v116_v21 = vpop.f32.mrf.mxu0 }
  0xe1   :  { %v117_v22 = vadd.f32 %v241_v20, %v116_v21 }
  0xe2   :  { %v271_v23 = vpop.f32.mrf.mxu0 }
  0xe3   :  { %314 = vtanh.f32 %v117_v22 }
  0xf0   :  { %v315_v24 = vpop.eup %314 }
  0xf1   :  { %305 = vmatmul.mubr.f32.vlgmr.msra.gmra.mxu1 %v315_v24 }
 0x1b1   :  { %v208_v26 = vpop.f32.mrf.mxu1 }
 0x1b2   :  { %v209_v27 = vadd.f32 %v243_v25, %v208_v26 }
 0x1b3   :  { %v306_v28 = vpop.f32.mrf.mxu1 }
 0x1b4   :  { %v244_v29 = vmul.f32 -1.442695, %v209_v27 }
 0x1b6   :  { %316 = vpow2.f32 %v244_v29 }
 0x1c3   :  { %v317_v30 = vpop.eup %316 }
 0x1c4   :  { %v220_v31 = vadd.f32 1.0, %v317_v30 }
 0x1c6   :  { %318 = vrcp.f32 %v220_v31 }
 0x1d3   :  { %v319_v34 = vpop.eup %318 }
 0x1d4   :  { %v223_v35 = vsel %vm216_vm4, %v319_v34, %v209_v27 }
 0x1d5   :  { %224 = vst [vmem:[#allocation7] sm:$0xff] %v223_v35 }
 0x1d6   :  { %371 = shalt.err (!%p368_p0)
}
 0x1d7   :  { %234 = dma.vmem_to_hbm [thread:$0]  %s232_s1, 128, %s419_s2, [#allocation4]  }
 0x1d8   :  { %384 = dma.done.wait [#allocation4], 128  }
 0x1d9   :  { %385 = vsyncadd [#allocation4], 4294967168 }
 0x1da   :  { %238 = vsyncpa [#allocation3], 1 }
 0x1db   :  { %239 = vsyncpa [#allocation6], 1 }
 0x1dc   :  { %240 = vsyncpa [#allocation4], 1 }

</bundles_post_ra>
